<compile_context>
chip_gen: v5e
topology: v5e:2x2
jax: 0.10.0
libtpu: 0.0.40
codegen_flags: <defaults>
</compile_context>

<pallas_src>
import functools

import jax
import jax.numpy as jnp
from jax.experimental import pallas as pl
from jax.experimental.pallas import tpu as pltpu

SLOPE_LEAKY_RELU = 0.01


def _leaky_relu(x):
    # max(x, slope*x) == leaky_relu for 0 <= slope <= 1; one VALU op instead of
    # compare + select.
    return jnp.maximum(x, SLOPE_LEAKY_RELU * x)


def _discriminator_kernel(x_ref, w1_ref, b1_ref, w2_ref, b2_ref, w3_ref, b3_ref,
                          out_ref, *, approx_recip):
    # Operands arrive in the compute dtype (bf16 by default); all matmuls
    # accumulate in f32 on the MXU, element-wise math stays in f32.
    x = x_ref[...]

    h1 = jnp.dot(x, w1_ref[...], preferred_element_type=jnp.float32) + b1_ref[...]
    h1 = _leaky_relu(h1)

    h2 = jnp.dot(h1.astype(w2_ref.dtype), w2_ref[...],
                 preferred_element_type=jnp.float32) + b2_ref[...]
    h2 = _leaky_relu(h2)

    h3 = jnp.dot(h2.astype(w3_ref.dtype), w3_ref[...],
                 preferred_element_type=jnp.float32) + b3_ref[...]

    # Numerically stable sigmoid: exp + reciprocal ride the EUP, one select on
    # the VPU.  Never overflows for large |h3|.
    z = jnp.exp(-jnp.abs(h3))
    inv = pl.reciprocal(1.0 + z, approx=approx_recip)
    sig = jnp.where(h3 >= 0, inv, z * inv)
    out_ref[...] = sig.astype(out_ref.dtype)


def _tpu_generation():
    try:
        kind = jax.devices()[0].device_kind.lower()
    except Exception:  # pragma: no cover - defensive, CPU/interpret fallbacks
        return None
    for gen in ("v7", "v6", "v5", "v4"):
        if gen in kind:
            return gen
    return None


def _tiling_defaults(compute_dtype):
    """(row_align, max_tile_b, mxu_m, want_two_steps, phys_vmem_bytes)."""
    itemsize = jnp.dtype(compute_dtype).itemsize
    # sublanes pack 32 bits: 8 rows f32, 16 rows bf16, 32 rows int8/fp8.
    row_align = max(8, 32 // max(itemsize, 1))
    gen = _tpu_generation()
    if gen == "v7":
        # 64 MiB VMEM/TC, 2 TensorCores per chip, 2x256^2 MXU.
        return row_align, 512, 256, True, 64 << 20
    if gen == "v6":
        # 128 MiB VMEM, 1 TC, 2x256^2 MXU -> big tiles are cheap.
        return row_align, 1024, 256, False, 128 << 20
    if gen == "v5":
        # 128 MiB VMEM, 4x128^2 MXU, lowest scoped-VMEM default.
        return row_align, 1024, 128, False, 128 << 20
    # Unknown / older: conservative.
    return row_align, 512, 128, False, 64 << 20


def prepare_params(params, *, compute_dtype=jnp.bfloat16):
    """One-time weight preparation: cast + lane-pad.  Do NOT redo per forward."""
    w1, b1 = params["w1"], params["b1"]
    w2, b2 = params["w2"], params["b2"]
    w3, b3 = params["w3"], params["b3"]

    dout = w3.shape[1]
    dout_p = max(128, pl.cdiv(dout, 128) * 128)   # lane-dense output width
    if dout_p != dout:
        w3 = jnp.pad(w3, ((0, 0), (0, dout_p - dout)))
        b3 = jnp.pad(b3, ((0, 0), (0, dout_p - dout)))

    return {
        "w1": w1.astype(compute_dtype), "b1": b1.astype(jnp.float32),
        "w2": w2.astype(compute_dtype), "b2": b2.astype(jnp.float32),
        "w3": w3.astype(compute_dtype), "b3": b3.astype(jnp.float32),
        "dout": int(dout), "dout_p": int(dout_p),
        "compute_dtype": jnp.dtype(compute_dtype),
    }


def discriminator_forward(x, prepared, *, tile_b=None, max_tile_b=None,
                          out_dtype=None):
    """Fused discriminator forward pass.

    x:        (B, dim_input) float32
    prepared: output of prepare_params(params, compute_dtype=...)
    Returns:  (B, output_size) float32 (matches the PyTorch module dtype).
    """
    w1, b1 = prepared["w1"], prepared["b1"]
    w2, b2 = prepared["w2"], prepared["b2"]
    w3, b3 = prepared["w3"], prepared["b3"]
    dout, dout_p = prepared["dout"], prepared["dout_p"]
    compute_dtype = prepared["compute_dtype"]
    itemsize = compute_dtype.itemsize

    B, din = x.shape
    h = w1.shape[1]

    # Low-precision lane-padded writeback halves the over-provisioned output
    # stream; sigmoid in [0,1] loses nothing meaningful at bf16.
    if out_dtype is None:
        out_dtype = compute_dtype if itemsize < 4 else jnp.float32
    out_itemsize = jnp.dtype(out_dtype).itemsize

    row_align, default_max_tile_b, mxu_m, want_two_steps, phys_vmem = (
        _tiling_defaults(compute_dtype))
    if max_tile_b is None:
        max_tile_b = default_max_tile_b

    def round_up(v, m):
        return ((v + m - 1) // m) * m

    # ---- batch tiling: pick tile_b first, then pad the batch to it ---------
    B_rows = round_up(B, row_align)
    if tile_b is None:
        if B_rows > max_tile_b:
            tile_b = round_up(max_tile_b, row_align)
        else:
            tile_b = B_rows
            if tile_b > mxu_m:
                tile_b = round_up(tile_b, mxu_m)   # MXU-native M granularity
        if want_two_steps and B_rows >= 2 * row_align:
            # >=2 grid steps so the "parallel" axis spans both v7x TensorCores.
            half = round_up(B_rows, 2 * row_align) // 2
            tile_b = min(tile_b, half)
    assert tile_b % row_align == 0, (
        f"tile_b ({tile_b}) must be a multiple of {row_align} for "
        f"{compute_dtype.name}")
    B_pad = round_up(B_rows, tile_b)            # padding to the tile is free
    grid = (B_pad // tile_b,)

    if B_pad != B:
        x = jnp.pad(x, ((0, B_pad - B), (0, 0)))
    x_c = x.astype(compute_dtype)

    # ---- VMEM budget: actual footprint + 30% headroom, clamped to physical --
    weight_bytes = (w1.size + w2.size + w3.size) * itemsize      # single-buffered
    bias_bytes = (b1.size + b2.size + b3.size) * 4
    x_tile_bytes = 2 * tile_b * din * itemsize                   # double-buffered
    out_tile_bytes = 2 * tile_b * dout_p * out_itemsize          # double-buffered
    act_bytes = 2 * tile_b * max(h, dout_p) * 4                  # f32 intermediates
    vmem_needed = (weight_bytes + bias_bytes + x_tile_bytes + out_tile_bytes
                   + act_bytes)
    vmem_limit = int(min(phys_vmem * 0.9, max(vmem_needed * 1.3, 24 << 20)))

    # TODO(synk): for very large hidden sizes (bf16 h >~ 2500 on v7x's 64 MiB
    # VMEM) add a hidden-dim tiling path (grid axis over h / emit_pipeline on
    # w2) instead of keeping all weights resident.

    cost = pl.CostEstimate(
        flops=2 * B_pad * (din * h + h * h + h * dout_p),
        transcendentals=B_pad * dout_p,
        bytes_accessed=int(x_c.size * itemsize + weight_bytes + bias_bytes
                           + B_pad * dout_p * out_itemsize))

    kernel = functools.partial(_discriminator_kernel,
                               approx_recip=bool(itemsize < 4))

    def call(single_buffer_weights):
        def full_spec(shape):
            index_map = lambda i: (0,) * len(shape)
            if single_buffer_weights:
                # Grid-invariant blocks: no point double-buffering them.
                return pl.BlockSpec(shape, index_map,
                                    pipeline_mode=pl.Buffered(1))
            return pl.BlockSpec(shape, index_map)

        return pl.pallas_call(
            kernel,
            out_shape=jax.ShapeDtypeStruct((B_pad, dout_p), out_dtype),
            grid_spec=pltpu.PrefetchScalarGridSpec(
                num_scalar_prefetch=0,
                grid=grid,
                in_specs=[
                    pl.BlockSpec((tile_b, din), lambda i: (i, 0)),  # x batch tile
                    full_spec((din, h)),      # w1
                    full_spec((1, h)),        # b1
                    full_spec((h, h)),        # w2
                    full_spec((1, h)),        # b2
                    full_spec((h, dout_p)),   # w3 (lane-padded)
                    full_spec((1, dout_p)),   # b3 (lane-padded)
                ],
                out_specs=pl.BlockSpec((tile_b, dout_p), lambda i: (i, 0)),
            ),
            compiler_params=pltpu.CompilerParams(
                dimension_semantics=("parallel",),
                vmem_limit_bytes=vmem_limit),
            cost_estimate=cost,
        )(x_c, w1, b1, w2, b2, w3, b3)

    try:
        out = call(single_buffer_weights=True)
    except Exception:  # fallback if pl.Buffered(1) is rejected by this jax rev
        out = call(single_buffer_weights=False)

    # Strip batch / lane padding; return f32 to match the PyTorch module.
    return out[:B, :dout].astype(jnp.float32)


def init_params(key, dim_input, hidden_size, output_size):
    """Deterministic init (PyTorch-style uniform(-1/sqrt(fan_in), +...))."""
    ks = jax.random.split(key, 6)

    def lin(kw, kb, fan_in, fan_out):
        bound = 1.0 / jnp.sqrt(jnp.float32(fan_in))
        w = jax.random.uniform(kw, (fan_in, fan_out), jnp.float32, -bound, bound)
        b = jax.random.uniform(kb, (1, fan_out), jnp.float32, -bound, bound)
        return w, b

    w1, b1 = lin(ks[0], ks[1], dim_input, hidden_size)
    w2, b2 = lin(ks[2], ks[3], hidden_size, hidden_size)
    w3, b3 = lin(ks[4], ks[5], hidden_size, output_size)
    return {"w1": w1, "b1": b1, "w2": w2, "b2": b2, "w3": w3, "b3": b3}


def reference_forward(x, p):
    """Plain-JAX f32 reference matching the PyTorch module semantics."""
    h1 = jax.nn.leaky_relu(x @ p["w1"] + p["b1"], SLOPE_LEAKY_RELU)
    h2 = jax.nn.leaky_relu(h1 @ p["w2"] + p["b2"], SLOPE_LEAKY_RELU)
    return jax.nn.sigmoid(h2 @ p["w3"] + p["b3"])


if __name__ == "__main__":
    key = jax.random.PRNGKey(0)
    k_x, k_p = jax.random.split(key)

    batch = 8
    dim_input = 16
    hidden_size = 32
    output_size = 1

    x = jax.random.normal(k_x, (batch, dim_input), jnp.float32)
    params = init_params(k_p, dim_input, hidden_size, output_size)
    ref = reference_forward(x, params)

    # f32 operand path: must match the f32 reference tightly.
    prep_f32 = prepare_params(params, compute_dtype=jnp.float32)
    out_f32 = jax.block_until_ready(discriminator_forward(x, prep_f32))
    assert out_f32.shape == (batch, output_size)
    assert jnp.allclose(out_f32, ref, atol=1e-5, rtol=1e-5), (
        f"f32 max abs err {jnp.max(jnp.abs(out_f32 - ref))}")

    # Default bf16-MXU path (f32 accumulation, low-precision writeback):
    # bf16-level tolerance (input/weight quantization is operand error).
    prep_bf16 = prepare_params(params, compute_dtype=jnp.bfloat16)
    out_bf16 = jax.block_until_ready(discriminator_forward(x, prep_bf16))
    assert out_bf16.shape == (batch, output_size)
    assert jnp.allclose(out_bf16, ref, atol=2e-2, rtol=2e-2), (
        f"bf16 max abs err {jnp.max(jnp.abs(out_bf16 - ref))}")

    print("KERNEL_OK")
</pallas_src>

<mosaic_0001>
module attributes {stable_mosaic.version = 11 : i64} {
  func.func @_discriminator_kernel(%arg0: i32, %arg1: memref<8x16xf32, #tpu.memory_space<vmem>>, %arg2: memref<16x32xf32, #tpu.memory_space<vmem>>, %arg3: memref<1x32xf32, #tpu.memory_space<vmem>>, %arg4: memref<32x32xf32, #tpu.memory_space<vmem>>, %arg5: memref<1x32xf32, #tpu.memory_space<vmem>>, %arg6: memref<32x128xf32, #tpu.memory_space<vmem>>, %arg7: memref<1x128xf32, #tpu.memory_space<vmem>>, %arg8: memref<8x128xf32, #tpu.memory_space<vmem>>) attributes {dimension_semantics = [#tpu.dimension_semantics<parallel>], iteration_bounds = array<i64: 1>, scalar_prefetch = 0 : i64, scratch_operands = 0 : i64, tpu.core_type = #tpu.core_type<tc>, window_params = [{transform_indices = @transform_0, window_bounds = array<i64: 8, 16>}, {pipeline_mode = #tpu.pipeline_mode<synchronous>, transform_indices = @transform_1, window_bounds = array<i64: 16, 32>}, {pipeline_mode = #tpu.pipeline_mode<synchronous>, transform_indices = @transform_2, window_bounds = array<i64: 1, 32>}, {pipeline_mode = #tpu.pipeline_mode<synchronous>, transform_indices = @transform_3, window_bounds = array<i64: 32, 32>}, {pipeline_mode = #tpu.pipeline_mode<synchronous>, transform_indices = @transform_4, window_bounds = array<i64: 1, 32>}, {pipeline_mode = #tpu.pipeline_mode<synchronous>, transform_indices = @transform_5, window_bounds = array<i64: 32, 128>}, {pipeline_mode = #tpu.pipeline_mode<synchronous>, transform_indices = @transform_6, window_bounds = array<i64: 1, 128>}, {transform_indices = @transform_7, window_bounds = array<i64: 8, 128>}]} {
    %c0 = arith.constant 0 : index
    %c0_0 = arith.constant 0 : index
    %0 = vector.load %arg1[%c0, %c0_0] : memref<8x16xf32, #tpu.memory_space<vmem>>, vector<8x16xf32>
    %c0_1 = arith.constant 0 : index
    %c0_2 = arith.constant 0 : index
    %1 = vector.load %arg2[%c0_1, %c0_2] : memref<16x32xf32, #tpu.memory_space<vmem>>, vector<16x32xf32>
    %cst = arith.constant dense<0.000000e+00> : vector<8x32xf32>
    %2 = tpu.matmul %0, %1, %cst {dimension_numbers = #tpu.dot_dimension_numbers<[1], [0], [0], [1], [0, 0, 1, 1], [], []>} : vector<8x16xf32>, vector<16x32xf32>, vector<8x32xf32> -> vector<8x32xf32>
    %c0_3 = arith.constant 0 : index
    %c0_4 = arith.constant 0 : index
    %3 = vector.load %arg3[%c0_3, %c0_4] : memref<1x32xf32, #tpu.memory_space<vmem>>, vector<1x32xf32>
    %4 = vector.broadcast %3 : vector<1x32xf32> to vector<8x32xf32>
    %5 = arith.addf %2, %4 : vector<8x32xf32>
    %cst_5 = arith.constant 0.00999999977 : f32
    %6 = vector.broadcast %cst_5 : f32 to vector<8x32xf32>
    %7 = arith.mulf %6, %5 : vector<8x32xf32>
    %8 = arith.maximumf %5, %7 : vector<8x32xf32>
    %c0_6 = arith.constant 0 : index
    %c0_7 = arith.constant 0 : index
    %9 = vector.load %arg4[%c0_6, %c0_7] : memref<32x32xf32, #tpu.memory_space<vmem>>, vector<32x32xf32>
    %cst_8 = arith.constant dense<0.000000e+00> : vector<8x32xf32>
    %10 = tpu.matmul %8, %9, %cst_8 {dimension_numbers = #tpu.dot_dimension_numbers<[1], [0], [0], [1], [0, 0, 1, 1], [], []>} : vector<8x32xf32>, vector<32x32xf32>, vector<8x32xf32> -> vector<8x32xf32>
    %c0_9 = arith.constant 0 : index
    %c0_10 = arith.constant 0 : index
    %11 = vector.load %arg5[%c0_9, %c0_10] : memref<1x32xf32, #tpu.memory_space<vmem>>, vector<1x32xf32>
    %12 = vector.broadcast %11 : vector<1x32xf32> to vector<8x32xf32>
    %13 = arith.addf %10, %12 : vector<8x32xf32>
    %cst_11 = arith.constant 0.00999999977 : f32
    %14 = vector.broadcast %cst_11 : f32 to vector<8x32xf32>
    %15 = arith.mulf %14, %13 : vector<8x32xf32>
    %16 = arith.maximumf %13, %15 : vector<8x32xf32>
    %c0_12 = arith.constant 0 : index
    %c0_13 = arith.constant 0 : index
    %17 = vector.load %arg6[%c0_12, %c0_13] : memref<32x128xf32, #tpu.memory_space<vmem>>, vector<32x128xf32>
    %cst_14 = arith.constant dense<0.000000e+00> : vector<8x128xf32>
    %18 = tpu.matmul %16, %17, %cst_14 {dimension_numbers = #tpu.dot_dimension_numbers<[1], [0], [0], [1], [0, 0, 1, 1], [], []>} : vector<8x32xf32>, vector<32x128xf32>, vector<8x128xf32> -> vector<8x128xf32>
    %c0_15 = arith.constant 0 : index
    %c0_16 = arith.constant 0 : index
    %19 = vector.load %arg7[%c0_15, %c0_16] : memref<1x128xf32, #tpu.memory_space<vmem>>, vector<1x128xf32>
    %20 = vector.broadcast %19 : vector<1x128xf32> to vector<8x128xf32>
    %21 = arith.addf %18, %20 : vector<8x128xf32>
    %22 = math.absf %21 : vector<8x128xf32>
    %cst_17 = arith.constant 0.000000e+00 : f32
    %23 = vector.broadcast %cst_17 : f32 to vector<8x128xf32>
    %24 = arith.subf %23, %22 : vector<8x128xf32>
    %25 = math.exp %24 : vector<8x128xf32>
    %cst_18 = arith.constant 1.000000e+00 : f32
    %26 = vector.broadcast %cst_18 : f32 to vector<8x128xf32>
    %27 = arith.addf %26, %25 : vector<8x128xf32>
    %28 = tpu.reciprocal %27 : vector<8x128xf32> -> vector<8x128xf32>
    %cst_19 = arith.constant 0.000000e+00 : f32
    %29 = vector.broadcast %cst_19 : f32 to vector<8x128xf32>
    %30 = arith.cmpf oge, %21, %29 : vector<8x128xf32>
    %31 = arith.mulf %25, %28 : vector<8x128xf32>
    %32 = arith.select %30, %28, %31 : vector<8x128xi1>, vector<8x128xf32>
    %c0_20 = arith.constant 0 : index
    %c0_21 = arith.constant 0 : index
    %33 = vector.load %arg8[%c0_20, %c0_21] : memref<8x128xf32, #tpu.memory_space<vmem>>, vector<8x128xf32>
    tpu.vector_store %arg8[%c0_20, %c0_21], %32 {strides = array<i32>} : memref<8x128xf32, #tpu.memory_space<vmem>>, vector<8x128xf32>,
    return
  }
  func.func @transform_0(%arg0: i32) -> (i32, i32) {
    %c0_i32 = arith.constant 0 : i32
    %c0_i32_0 = arith.constant 0 : i32
    return %arg0, %c0_i32 : i32, i32
  }
  func.func @transform_1(%arg0: i32) -> (i32, i32) {
    %c0_i32 = arith.constant 0 : i32
    %c0_i32_0 = arith.constant 0 : i32
    %c0_i32_1 = arith.constant 0 : i32
    return %c0_i32, %c0_i32_0 : i32, i32
  }
  func.func @transform_2(%arg0: i32) -> (i32, i32) {
    %c0_i32 = arith.constant 0 : i32
    %c0_i32_0 = arith.constant 0 : i32
    %c0_i32_1 = arith.constant 0 : i32
    return %c0_i32, %c0_i32_0 : i32, i32
  }
  func.func @transform_3(%arg0: i32) -> (i32, i32) {
    %c0_i32 = arith.constant 0 : i32
    %c0_i32_0 = arith.constant 0 : i32
    %c0_i32_1 = arith.constant 0 : i32
    return %c0_i32, %c0_i32_0 : i32, i32
  }
  func.func @transform_4(%arg0: i32) -> (i32, i32) {
    %c0_i32 = arith.constant 0 : i32
    %c0_i32_0 = arith.constant 0 : i32
    %c0_i32_1 = arith.constant 0 : i32
    return %c0_i32, %c0_i32_0 : i32, i32
  }
  func.func @transform_5(%arg0: i32) -> (i32, i32) {
    %c0_i32 = arith.constant 0 : i32
    %c0_i32_0 = arith.constant 0 : i32
    %c0_i32_1 = arith.constant 0 : i32
    return %c0_i32, %c0_i32_0 : i32, i32
  }
  func.func @transform_6(%arg0: i32) -> (i32, i32) {
    %c0_i32 = arith.constant 0 : i32
    %c0_i32_0 = arith.constant 0 : i32
    %c0_i32_1 = arith.constant 0 : i32
    return %c0_i32, %c0_i32_0 : i32, i32
  }
  func.func @transform_7(%arg0: i32) -> (i32, i32) {
    %c0_i32 = arith.constant 0 : i32
    %c0_i32_0 = arith.constant 0 : i32
    return %arg0, %c0_i32 : i32, i32
  }
}

module attributes {stable_mosaic.version = 11 : i64} {
  func.func @_discriminator_kernel(%arg0: i32, %arg1: memref<8x16xf32, #tpu.memory_space<vmem>>, %arg2: memref<16x32xf32, #tpu.memory_space<vmem>>, %arg3: memref<1x32xf32, #tpu.memory_space<vmem>>, %arg4: memref<32x32xf32, #tpu.memory_space<vmem>>, %arg5: memref<1x32xf32, #tpu.memory_space<vmem>>, %arg6: memref<32x128xf32, #tpu.memory_space<vmem>>, %arg7: memref<1x128xf32, #tpu.memory_space<vmem>>, %arg8: memref<8x128xf32, #tpu.memory_space<vmem>>) attributes {dimension_semantics = [#tpu.dimension_semantics<parallel>], iteration_bounds = array<i64: 1>, scalar_prefetch = 0 : i64, scratch_operands = 0 : i64, tpu.core_type = #tpu.core_type<tc>, window_params = [{transform_indices = @transform_0, window_bounds = array<i64: 8, 16>}, {pipeline_mode = #tpu.pipeline_mode<synchronous>, transform_indices = @transform_1, window_bounds = array<i64: 16, 32>}, {pipeline_mode = #tpu.pipeline_mode<synchronous>, transform_indices = @transform_2, window_bounds = array<i64: 1, 32>}, {pipeline_mode = #tpu.pipeline_mode<synchronous>, transform_indices = @transform_3, window_bounds = array<i64: 32, 32>}, {pipeline_mode = #tpu.pipeline_mode<synchronous>, transform_indices = @transform_4, window_bounds = array<i64: 1, 32>}, {pipeline_mode = #tpu.pipeline_mode<synchronous>, transform_indices = @transform_5, window_bounds = array<i64: 32, 128>}, {pipeline_mode = #tpu.pipeline_mode<synchronous>, transform_indices = @transform_6, window_bounds = array<i64: 1, 128>}, {transform_indices = @transform_7, window_bounds = array<i64: 8, 128>}]} {
    %c0 = arith.constant 0 : index
    %c0_0 = arith.constant 0 : index
    %0 = vector.load %arg1[%c0, %c0_0] : memref<8x16xf32, #tpu.memory_space<vmem>>, vector<8x16xf32>
    %c0_1 = arith.constant 0 : index
    %c0_2 = arith.constant 0 : index
    %1 = vector.load %arg2[%c0_1, %c0_2] : memref<16x32xf32, #tpu.memory_space<vmem>>, vector<16x32xf32>
    %cst = arith.constant dense<0.000000e+00> : vector<8x32xf32>
    %2 = tpu.matmul %0, %1, %cst {dimension_numbers = #tpu.dot_dimension_numbers<[1], [0], [0], [1], [0, 0, 1, 1], [], []>} : vector<8x16xf32>, vector<16x32xf32>, vector<8x32xf32> -> vector<8x32xf32>
    %c0_3 = arith.constant 0 : index
    %c0_4 = arith.constant 0 : index
    %3 = vector.load %arg3[%c0_3, %c0_4] : memref<1x32xf32, #tpu.memory_space<vmem>>, vector<1x32xf32>
    %4 = vector.broadcast %3 : vector<1x32xf32> to vector<8x32xf32>
    %5 = arith.addf %2, %4 : vector<8x32xf32>
    %cst_5 = arith.constant 0.00999999977 : f32
    %6 = vector.broadcast %cst_5 : f32 to vector<8x32xf32>
    %7 = arith.mulf %6, %5 : vector<8x32xf32>
    %8 = arith.maximumf %5, %7 : vector<8x32xf32>
    %c0_6 = arith.constant 0 : index
    %c0_7 = arith.constant 0 : index
    %9 = vector.load %arg4[%c0_6, %c0_7] : memref<32x32xf32, #tpu.memory_space<vmem>>, vector<32x32xf32>
    %cst_8 = arith.constant dense<0.000000e+00> : vector<8x32xf32>
    %10 = tpu.matmul %8, %9, %cst_8 {dimension_numbers = #tpu.dot_dimension_numbers<[1], [0], [0], [1], [0, 0, 1, 1], [], []>} : vector<8x32xf32>, vector<32x32xf32>, vector<8x32xf32> -> vector<8x32xf32>
    %c0_9 = arith.constant 0 : index
    %c0_10 = arith.constant 0 : index
    %11 = vector.load %arg5[%c0_9, %c0_10] : memref<1x32xf32, #tpu.memory_space<vmem>>, vector<1x32xf32>
    %12 = vector.broadcast %11 : vector<1x32xf32> to vector<8x32xf32>
    %13 = arith.addf %10, %12 : vector<8x32xf32>
    %cst_11 = arith.constant 0.00999999977 : f32
    %14 = vector.broadcast %cst_11 : f32 to vector<8x32xf32>
    %15 = arith.mulf %14, %13 : vector<8x32xf32>
    %16 = arith.maximumf %13, %15 : vector<8x32xf32>
    %c0_12 = arith.constant 0 : index
    %c0_13 = arith.constant 0 : index
    %17 = vector.load %arg6[%c0_12, %c0_13] : memref<32x128xf32, #tpu.memory_space<vmem>>, vector<32x128xf32>
    %cst_14 = arith.constant dense<0.000000e+00> : vector<8x128xf32>
    %18 = tpu.matmul %16, %17, %cst_14 {dimension_numbers = #tpu.dot_dimension_numbers<[1], [0], [0], [1], [0, 0, 1, 1], [], []>} : vector<8x32xf32>, vector<32x128xf32>, vector<8x128xf32> -> vector<8x128xf32>
    %c0_15 = arith.constant 0 : index
    %c0_16 = arith.constant 0 : index
    %19 = vector.load %arg7[%c0_15, %c0_16] : memref<1x128xf32, #tpu.memory_space<vmem>>, vector<1x128xf32>
    %20 = vector.broadcast %19 : vector<1x128xf32> to vector<8x128xf32>
    %21 = arith.addf %18, %20 : vector<8x128xf32>
    %22 = math.absf %21 : vector<8x128xf32>
    %cst_17 = arith.constant 0.000000e+00 : f32
    %23 = vector.broadcast %cst_17 : f32 to vector<8x128xf32>
    %24 = arith.subf %23, %22 : vector<8x128xf32>
    %25 = math.exp %24 : vector<8x128xf32>
    %cst_18 = arith.constant 1.000000e+00 : f32
    %26 = vector.broadcast %cst_18 : f32 to vector<8x128xf32>
    %27 = arith.addf %26, %25 : vector<8x128xf32>
    %28 = tpu.reciprocal %27 : vector<8x128xf32> -> vector<8x128xf32>
    %cst_19 = arith.constant 0.000000e+00 : f32
    %29 = vector.broadcast %cst_19 : f32 to vector<8x128xf32>
    %30 = arith.cmpf oge, %21, %29 : vector<8x128xf32>
    %31 = arith.mulf %25, %28 : vector<8x128xf32>
    %32 = arith.select %30, %28, %31 : vector<8x128xi1>, vector<8x128xf32>
    %c0_20 = arith.constant 0 : index
    %c0_21 = arith.constant 0 : index
    %33 = vector.load %arg8[%c0_20, %c0_21] : memref<8x128xf32, #tpu.memory_space<vmem>>, vector<8x128xf32>
    tpu.vector_store %arg8[%c0_20, %c0_21], %32 {strides = array<i32>} : memref<8x128xf32, #tpu.memory_space<vmem>>, vector<8x128xf32>,
    return
  }
  func.func @transform_0(%arg0: i32) -> (i32, i32) {
    %c0_i32 = arith.constant 0 : i32
    %c0_i32_0 = arith.constant 0 : i32
    return %arg0, %c0_i32 : i32, i32
  }
  func.func @transform_1(%arg0: i32) -> (i32, i32) {
    %c0_i32 = arith.constant 0 : i32
    %c0_i32_0 = arith.constant 0 : i32
    %c0_i32_1 = arith.constant 0 : i32
    return %c0_i32, %c0_i32_0 : i32, i32
  }
  func.func @transform_2(%arg0: i32) -> (i32, i32) {
    %c0_i32 = arith.constant 0 : i32
    %c0_i32_0 = arith.constant 0 : i32
    %c0_i32_1 = arith.constant 0 : i32
    return %c0_i32, %c0_i32_0 : i32, i32
  }
  func.func @transform_3(%arg0: i32) -> (i32, i32) {
    %c0_i32 = arith.constant 0 : i32
    %c0_i32_0 = arith.constant 0 : i32
    %c0_i32_1 = arith.constant 0 : i32
    return %c0_i32, %c0_i32_0 : i32, i32
  }
  func.func @transform_4(%arg0: i32) -> (i32, i32) {
    %c0_i32 = arith.constant 0 : i32
    %c0_i32_0 = arith.constant 0 : i32
    %c0_i32_1 = arith.constant 0 : i32
    return %c0_i32, %c0_i32_0 : i32, i32
  }
  func.func @transform_5(%arg0: i32) -> (i32, i32) {
    %c0_i32 = arith.constant 0 : i32
    %c0_i32_0 = arith.constant 0 : i32
    %c0_i32_1 = arith.constant 0 : i32
    return %c0_i32, %c0_i32_0 : i32, i32
  }
  func.func @transform_6(%arg0: i32) -> (i32, i32) {
    %c0_i32 = arith.constant 0 : i32
    %c0_i32_0 = arith.constant 0 : i32
    %c0_i32_1 = arith.constant 0 : i32
    return %c0_i32, %c0_i32_0 : i32, i32
  }
  func.func @transform_7(%arg0: i32) -> (i32, i32) {
    %c0_i32 = arith.constant 0 : i32
    %c0_i32_0 = arith.constant 0 : i32
    return %arg0, %c0_i32 : i32, i32
  }
}

</mosaic_0001>

<bundles_post_ra>
// kernel: tpu_custom_call.1
= control target key start
LH: loop header
LB: loop body
LE: loop exit
PB: predicated region body
PF: predicated region fallthrough
CT: control target
= control target key end

     0   :  { %12 = vsyncpa [#allocation3], 0  ;;  %s446_s0 = inlined_call_operand.hbm [shape: f32[8,16], index: 0, kind: input, shape index: {}]   ;;  %s447_s1 = inlined_call_operand.hbm [shape: f32[16,32], index: 1, kind: input, shape index: {}]   ;;  %s448_s2 = inlined_call_operand.vmem [shape: f32[1,32], index: 2, kind: input, shape index: {}]   ;;  %s449_s3 = inlined_call_operand.hbm [shape: f32[32,32], index: 3, kind: input, shape index: {}]   ;;  %s450_s4 = inlined_call_operand.vmem [shape: f32[1,32], index: 4, kind: input, shape index: {}]   ;;  %s451_s5 = inlined_call_operand.hbm [shape: f32[32,128], index: 5, kind: input, shape index: {}]   ;;  %s452_s6 = inlined_call_operand.vmem [shape: f32[1,128], index: 6, kind: input, shape index: {}]   ;;  %s453_s7 = inlined_call_operand.hbm [shape: f32[8,128], index: 7, kind: output, shape index: {}]  }
   0x1   :  { %13 = vsyncpa [#allocation6], 0 }
   0x2   :  { %14 = vsyncpa [#allocation9], 0  ;;  %s31_s26 = sshll.u32 %s447_s1, 4  ;;  %s32_s26 = int_to_ptr.hbm [resolvable:$true] %s31_s26 }
   0x3   :  { %15 = vsyncpa [#allocation4], 0  ;;  %s373_s27 = smov [#allocation5]   ;;  %s21_s8 = sshll.u32 %s446_s0, 4  ;;  %s22_s8 = int_to_ptr.hbm [resolvable:$true] %s21_s8 }
   0x4   :  { %s33_s28 = sshll.u32 %s373_s27, 4  ;;  %s374_s9 = smov 128   ;;  %s34_s28 = int_to_ptr.vmem [resolvable:$true] %s33_s28 }
   0x5   :  { %s375_s10 = smov 8   ;;  %s376_s11 = smov [#allocation2]  }
   0x6   :  { %39 = dma.hbm_to_vmem [thread:$0]  %s32_s26, 256, %s34_s28, [#allocation6], %s374_s9, %s374_s9, %s375_s10  }
   0x7   :  { %s23_s12 = sshll.u32 %s376_s11, 4  ;;  %s46_s15 = sshll.u32 %s449_s3, 4  ;;  %s24_s12 = int_to_ptr.vmem [resolvable:$true] %s23_s12  ;;  %s47_s15 = int_to_ptr.hbm [resolvable:$true] %s46_s15 }
   0x8   :  { %26 = dma.hbm_to_vmem [thread:$0]  %s22_s8, 128, %s24_s12, [#allocation3]  }
   0x9   :  { %s61_s17 = sshll.u32 %s451_s5, 4  ;;  %s377_s18 = smov [#allocation7]   ;;  %s62_s17 = int_to_ptr.hbm [resolvable:$true] %s61_s17 }
   0xa   :  { %s48_s19 = sshll.u32 %s377_s18, 4  ;;  %s378_s0 = smov [#allocation8]   ;;  %s49_s19 = int_to_ptr.vmem [resolvable:$true] %s48_s19 }
   0xb   :  { %54 = dma.hbm_to_vmem [thread:$0]  %s47_s15, 512, %s49_s19, [#allocation6], %s374_s9, %s374_s9, %s375_s10  }
   0xc   :  { %s63_s20 = sshll.u32 %s378_s0, 4  ;;  %s64_s20 = int_to_ptr.vmem [resolvable:$true] %s63_s20 }
   0xd   :  { %69 = dma.hbm_to_vmem [thread:$0]  %s62_s17, 512, %s64_s20, [#allocation9], %s374_s9, %s374_s9, %s375_s10  }
   0xe   :  { %365 = dma.done.wait [#allocation3], 128  }
   0xf   :  { %366 = vsyncadd [#allocation3], 4294967168 }
  0x10   :  { %367 = dma.done.wait [#allocation6], 768  }
  0x11   :  { %368 = vsyncadd [#allocation6], 4294966528 }
  0x12   :  { %369 = dma.done.wait [#allocation9], 512  }
  0x13   :  { %370 = vsyncadd [#allocation9], 4294966784  ;;  %v90_v0 = vld [vmem:[#allocation5 + $0x8] sm:$0xff]  ;;  %v89_v1 = vld [vmem:[#allocation5] sm:$0xff]  ;;  %vm95_vm0 = vcmask 130048   ;;  %vm129_vm1 = vcmask 261120  }
  0x14   :  { %113 = vmatpush.msra.mxu0 %v90_v0  ;;  %v88_v2 = vld [vmem:[#allocation2] sm:$0xff]  ;;  %v124_v3 = vld [vmem:[#allocation7 + $0x18] sm:$0xff]  ;;  %v123_v4 = vld [vmem:[#allocation7 + $0x10] sm:$0xff]  ;;  %s216_s26 = sshll.u32 %s453_s7, 4  ;;  %s217_s26 = int_to_ptr.hbm [resolvable:$true] %s216_s26 }
  0x15   :  { %145 = vmatpush.msra.mxu1 %v124_v3  ;;  %v122_v5 = vld [vmem:[#allocation7 + $0x8] sm:$0xff]  ;;  %v121_v6 = vld [vmem:[#allocation7] sm:$0xff]  ;;  %v158_v12 = vld [vmem:[#allocation8 + $0x18] sm:$0xff] }
  0x16   :  { %114 = vmatpush.msra.mxu0 %v89_v1  ;;  %v238_v7 = vld [vmem:[%s448_s2] ss:$0 sm:$0xff]  ;;  %178 = vmatpush.msra.mxu2 %v158_v12  ;;  %v157_v13 = vld [vmem:[#allocation8 + $0x10] sm:$0xff]  ;;  %v155_v15 = vld [vmem:[#allocation8] sm:$0xff] }
  0x17   :  { %228 = vmatmul.msk.f32.vlgmr.msra.gmra.mxu0 %vm95_vm0, %v88_v2  ;;  %146 = vmatpush.msra.mxu1 %v123_v4  ;;  %v156_v14 = vld [vmem:[#allocation8 + $0x8] sm:$0xff] }
  0x18   :  { %179 = vmatpush.msra.mxu2 %v157_v13  ;;  %v239_v16 = vld [vmem:[%s450_s4] ss:$0 sm:$0xff]  ;;  %s379_s4 = smov [#allocation10]  }
  0x19   :  { %147 = vmatpush.msra.mxu1 %v122_v5  ;;  %v240_v21 = vld [vmem:[%s452_s6] ss:$0 sm:$0xff]  ;;  %s214_s6 = sshll.u32 %s379_s4, 4  ;;  %s215_s6 = int_to_ptr.vmem [resolvable:$true] %s214_s6 }
  0x1a   :  { %180 = vmatpush.msra.mxu2 %v156_v14 }
  0x1b   :  { %148 = vmatpush.msra.mxu1 %v121_v6 }
  0x1c   :  { %181 = vmatpush.msra.mxu2 %v155_v15 }
  0x94   :  { %v116_v8 = vpop.f32.mrf.mxu0 }
  0x95   :  { %v117_v9 = vadd.f32 %v238_v7, %v116_v8 }
  0x97   :  { %v119_v10 = vmul.f32 0.01, %v117_v9 }
  0x99   :  { %v120_v11 = vmax.f32 %v117_v9, %v119_v10 }
  0x9b   :  { %229 = vmatmul.msk.f32.vlgmr.msra.gmra.mxu1 %vm129_vm1, %v120_v11 }
 0x118   :  { %v150_v17 = vpop.f32.mrf.mxu1 }
 0x119   :  { %v151_v18 = vadd.f32 %v239_v16, %v150_v17 }
 0x11b   :  { %v153_v19 = vmul.f32 0.01, %v151_v18 }
 0x11d   :  { %v154_v20 = vmax.f32 %v151_v18, %v153_v19 }
 0x11f   :  { %230 = vmatmul.msk.f32.vlgmr.msra.gmra.mxu2 %vm129_vm1, %v154_v20 }
 0x1a2   :  { %v183_v22 = vpop.f32.mrf.mxu2 }
 0x1a3   :  { %v184_v23 = vadd.f32 %v240_v21, %v183_v22 }
 0x1a5   :  { %v186_v24 = vand.u32 2147483647, %v184_v23  ;;  %vm205_vm6 = vcmp.ge.f32.partialorder %v184_v23, 0.0 }
 0x1a7   :  { %v187_v25 = vsub.f32 0.0, %v186_v24 }
 0x1a9   :  { %v188_v26 = vmul.f32 1.442695, %v187_v25 }
 0x1ab   :  { %241 = vpow2.f32 %v188_v26 }
 0x1b1   :  { %v242_v27 = vpop.eup %241 }
 0x1b2   :  { %v190_v28 = vadd.f32 1.0, %v242_v27 }
 0x1b4   :  { %243 = vrcp.f32 %v190_v28  ;;  %v202_v32 = vand.u32 2147483648, %v190_v28  ;;  %v200_v34 = vand.u32 2147483647, %v190_v28  ;;  %vm196_vm3 = vweird.f32 %v190_v28 }
 0x1b6   :  { %v203_v36 = vor.u32 1.1754944e-38, %v202_v32  ;;  %vm201_vm5 = vcmp.eq.f32.partialorder %v200_v34, 8.507059e+37 }
 0x1ba   :  { %v244_v29 = vpop.eup %243 }
 0x1bb   :  { %v192_v30 = vmul.f32 %v244_v29, %v190_v28  ;;  %vm197_vm2 = vweird.f32 %v244_v29 }
 0x1bc   :  { %vm198_vm4 = vmor %vm196_vm3, %vm197_vm2 }
 0x1bd   :  { %v193_v31 = vsub.f32 1.0, %v192_v30 }
 0x1bf   :  { %v194_v33 = vmul.f32 %v244_v29, %v193_v31 }
 0x1c1   :  { %v195_v35 = vadd.f32 %v244_v29, %v194_v33 }
 0x1c3   :  { %v199_v37 = vsel %vm198_vm4, %v244_v29, %v195_v35 }
 0x1c4   :  { %v204_v38 = vsel %vm201_vm5, %v203_v36, %v199_v37 }
 0x1c5   :  { %v206_v39 = vmul.f32 %v242_v27, %v204_v38 }
 0x1c7   :  { %v207_v40 = vsel %vm205_vm6, %v204_v38, %v206_v39 }
 0x1c8   :  { %208 = vst [vmem:[#allocation10] sm:$0xff] %v207_v40 }
 0x1c9   :  { %219 = dma.vmem_to_hbm [thread:$0]  %s215_s6, 128, %s217_s26, [#allocation4]  }
 0x1ca   :  { %371 = dma.done.wait [#allocation4], 128  }
 0x1cb   :  { %372 = vsyncadd [#allocation4], 4294967168 }
 0x1cc   :  { %224 = vsyncpa [#allocation3], 1 }
 0x1cd   :  { %225 = vsyncpa [#allocation6], 1 }
 0x1ce   :  { %226 = vsyncpa [#allocation9], 1 }
 0x1cf   :  { %227 = vsyncpa [#allocation4], 1 }

// kernel: tpu_custom_call.1
= control target key start
LH: loop header
LB: loop body
LE: loop exit
PB: predicated region body
PF: predicated region fallthrough
CT: control target
= control target key end

     0   :  { %12 = vsyncpa [#allocation3], 0  ;;  %s446_s0 = inlined_call_operand.hbm [shape: f32[8,16], index: 0, kind: input, shape index: {}]   ;;  %s447_s1 = inlined_call_operand.hbm [shape: f32[16,32], index: 1, kind: input, shape index: {}]   ;;  %s448_s2 = inlined_call_operand.vmem [shape: f32[1,32], index: 2, kind: input, shape index: {}]   ;;  %s449_s3 = inlined_call_operand.hbm [shape: f32[32,32], index: 3, kind: input, shape index: {}]   ;;  %s450_s4 = inlined_call_operand.vmem [shape: f32[1,32], index: 4, kind: input, shape index: {}]   ;;  %s451_s5 = inlined_call_operand.hbm [shape: f32[32,128], index: 5, kind: input, shape index: {}]   ;;  %s452_s6 = inlined_call_operand.vmem [shape: f32[1,128], index: 6, kind: input, shape index: {}]   ;;  %s453_s7 = inlined_call_operand.hbm [shape: f32[8,128], index: 7, kind: output, shape index: {}]  }
   0x1   :  { %13 = vsyncpa [#allocation6], 0 }
   0x2   :  { %14 = vsyncpa [#allocation9], 0  ;;  %s31_s26 = sshll.u32 %s447_s1, 4  ;;  %s32_s26 = int_to_ptr.hbm [resolvable:$true] %s31_s26 }
   0x3   :  { %15 = vsyncpa [#allocation4], 0  ;;  %s373_s27 = smov [#allocation5]   ;;  %s21_s8 = sshll.u32 %s446_s0, 4  ;;  %s22_s8 = int_to_ptr.hbm [resolvable:$true] %s21_s8 }
   0x4   :  { %s33_s28 = sshll.u32 %s373_s27, 4  ;;  %s374_s9 = smov 128   ;;  %s34_s28 = int_to_ptr.vmem [resolvable:$true] %s33_s28 }
   0x5   :  { %s375_s10 = smov 8   ;;  %s376_s11 = smov [#allocation2]  }
   0x6   :  { %39 = dma.hbm_to_vmem [thread:$0]  %s32_s26, 256, %s34_s28, [#allocation6], %s374_s9, %s374_s9, %s375_s10  }
   0x7   :  { %s23_s12 = sshll.u32 %s376_s11, 4  ;;  %s46_s15 = sshll.u32 %s449_s3, 4  ;;  %s24_s12 = int_to_ptr.vmem [resolvable:$true] %s23_s12  ;;  %s47_s15 = int_to_ptr.hbm [resolvable:$true] %s46_s15 }
   0x8   :  { %26 = dma.hbm_to_vmem [thread:$0]  %s22_s8, 128, %s24_s12, [#allocation3]  }
   0x9   :  { %s61_s17 = sshll.u32 %s451_s5, 4  ;;  %s377_s18 = smov [#allocation7]   ;;  %s62_s17 = int_to_ptr.hbm [resolvable:$true] %s61_s17 }
   0xa   :  { %s48_s19 = sshll.u32 %s377_s18, 4  ;;  %s378_s0 = smov [#allocation8]   ;;  %s49_s19 = int_to_ptr.vmem [resolvable:$true] %s48_s19 }
   0xb   :  { %54 = dma.hbm_to_vmem [thread:$0]  %s47_s15, 512, %s49_s19, [#allocation6], %s374_s9, %s374_s9, %s375_s10  }
   0xc   :  { %s63_s20 = sshll.u32 %s378_s0, 4  ;;  %s64_s20 = int_to_ptr.vmem [resolvable:$true] %s63_s20 }
   0xd   :  { %69 = dma.hbm_to_vmem [thread:$0]  %s62_s17, 512, %s64_s20, [#allocation9], %s374_s9, %s374_s9, %s375_s10  }
   0xe   :  { %365 = dma.done.wait [#allocation3], 128  }
   0xf   :  { %366 = vsyncadd [#allocation3], 4294967168 }
  0x10   :  { %367 = dma.done.wait [#allocation6], 768  }
  0x11   :  { %368 = vsyncadd [#allocation6], 4294966528 }
  0x12   :  { %369 = dma.done.wait [#allocation9], 512  }
  0x13   :  { %370 = vsyncadd [#allocation9], 4294966784  ;;  %v90_v0 = vld [vmem:[#allocation5 + $0x8] sm:$0xff]  ;;  %v89_v1 = vld [vmem:[#allocation5] sm:$0xff]  ;;  %vm95_vm0 = vcmask 130048   ;;  %vm129_vm1 = vcmask 261120  }
  0x14   :  { %113 = vmatpush.msra.mxu0 %v90_v0  ;;  %v88_v2 = vld [vmem:[#allocation2] sm:$0xff]  ;;  %v124_v3 = vld [vmem:[#allocation7 + $0x18] sm:$0xff]  ;;  %v123_v4 = vld [vmem:[#allocation7 + $0x10] sm:$0xff]  ;;  %s216_s26 = sshll.u32 %s453_s7, 4  ;;  %s217_s26 = int_to_ptr.hbm [resolvable:$true] %s216_s26 }
  0x15   :  { %145 = vmatpush.msra.mxu1 %v124_v3  ;;  %v122_v5 = vld [vmem:[#allocation7 + $0x8] sm:$0xff]  ;;  %v121_v6 = vld [vmem:[#allocation7] sm:$0xff]  ;;  %v158_v12 = vld [vmem:[#allocation8 + $0x18] sm:$0xff] }
  0x16   :  { %114 = vmatpush.msra.mxu0 %v89_v1  ;;  %v238_v7 = vld [vmem:[%s448_s2] ss:$0 sm:$0xff]  ;;  %178 = vmatpush.msra.mxu2 %v158_v12  ;;  %v157_v13 = vld [vmem:[#allocation8 + $0x10] sm:$0xff]  ;;  %v155_v15 = vld [vmem:[#allocation8] sm:$0xff] }
  0x17   :  { %228 = vmatmul.msk.f32.vlgmr.msra.gmra.mxu0 %vm95_vm0, %v88_v2  ;;  %146 = vmatpush.msra.mxu1 %v123_v4  ;;  %v156_v14 = vld [vmem:[#allocation8 + $0x8] sm:$0xff] }
  0x18   :  { %179 = vmatpush.msra.mxu2 %v157_v13  ;;  %v239_v16 = vld [vmem:[%s450_s4] ss:$0 sm:$0xff]  ;;  %s379_s4 = smov [#allocation10]  }
  0x19   :  { %147 = vmatpush.msra.mxu1 %v122_v5  ;;  %v240_v21 = vld [vmem:[%s452_s6] ss:$0 sm:$0xff]  ;;  %s214_s6 = sshll.u32 %s379_s4, 4  ;;  %s215_s6 = int_to_ptr.vmem [resolvable:$true] %s214_s6 }
  0x1a   :  { %180 = vmatpush.msra.mxu2 %v156_v14 }
  0x1b   :  { %148 = vmatpush.msra.mxu1 %v121_v6 }
  0x1c   :  { %181 = vmatpush.msra.mxu2 %v155_v15 }
  0x94   :  { %v116_v8 = vpop.f32.mrf.mxu0 }
  0x95   :  { %v117_v9 = vadd.f32 %v238_v7, %v116_v8 }
  0x97   :  { %v119_v10 = vmul.f32 0.01, %v117_v9 }
  0x99   :  { %v120_v11 = vmax.f32 %v117_v9, %v119_v10 }
  0x9b   :  { %229 = vmatmul.msk.f32.vlgmr.msra.gmra.mxu1 %vm129_vm1, %v120_v11 }
 0x118   :  { %v150_v17 = vpop.f32.mrf.mxu1 }
 0x119   :  { %v151_v18 = vadd.f32 %v239_v16, %v150_v17 }
 0x11b   :  { %v153_v19 = vmul.f32 0.01, %v151_v18 }
 0x11d   :  { %v154_v20 = vmax.f32 %v151_v18, %v153_v19 }
 0x11f   :  { %230 = vmatmul.msk.f32.vlgmr.msra.gmra.mxu2 %vm129_vm1, %v154_v20 }
 0x1a2   :  { %v183_v22 = vpop.f32.mrf.mxu2 }
 0x1a3   :  { %v184_v23 = vadd.f32 %v240_v21, %v183_v22 }
 0x1a5   :  { %v186_v24 = vand.u32 2147483647, %v184_v23  ;;  %vm205_vm6 = vcmp.ge.f32.partialorder %v184_v23, 0.0 }
 0x1a7   :  { %v187_v25 = vsub.f32 0.0, %v186_v24 }
 0x1a9   :  { %v188_v26 = vmul.f32 1.442695, %v187_v25 }
 0x1ab   :  { %241 = vpow2.f32 %v188_v26 }
 0x1b1   :  { %v242_v27 = vpop.eup %241 }
 0x1b2   :  { %v190_v28 = vadd.f32 1.0, %v242_v27 }
 0x1b4   :  { %243 = vrcp.f32 %v190_v28  ;;  %v202_v32 = vand.u32 2147483648, %v190_v28  ;;  %v200_v34 = vand.u32 2147483647, %v190_v28  ;;  %vm196_vm3 = vweird.f32 %v190_v28 }
 0x1b6   :  { %v203_v36 = vor.u32 1.1754944e-38, %v202_v32  ;;  %vm201_vm5 = vcmp.eq.f32.partialorder %v200_v34, 8.507059e+37 }
 0x1ba   :  { %v244_v29 = vpop.eup %243 }
 0x1bb   :  { %v192_v30 = vmul.f32 %v244_v29, %v190_v28  ;;  %vm197_vm2 = vweird.f32 %v244_v29 }
 0x1bc   :  { %vm198_vm4 = vmor %vm196_vm3, %vm197_vm2 }
 0x1bd   :  { %v193_v31 = vsub.f32 1.0, %v192_v30 }
 0x1bf   :  { %v194_v33 = vmul.f32 %v244_v29, %v193_v31 }
 0x1c1   :  { %v195_v35 = vadd.f32 %v244_v29, %v194_v33 }
 0x1c3   :  { %v199_v37 = vsel %vm198_vm4, %v244_v29, %v195_v35 }
 0x1c4   :  { %v204_v38 = vsel %vm201_vm5, %v203_v36, %v199_v37 }
 0x1c5   :  { %v206_v39 = vmul.f32 %v242_v27, %v204_v38 }
 0x1c7   :  { %v207_v40 = vsel %vm205_vm6, %v204_v38, %v206_v39 }
 0x1c8   :  { %208 = vst [vmem:[#allocation10] sm:$0xff] %v207_v40 }
 0x1c9   :  { %219 = dma.vmem_to_hbm [thread:$0]  %s215_s6, 128, %s217_s26, [#allocation4]  }
 0x1ca   :  { %371 = dma.done.wait [#allocation4], 128  }
 0x1cb   :  { %372 = vsyncadd [#allocation4], 4294967168 }
 0x1cc   :  { %224 = vsyncpa [#allocation3], 1 }
 0x1cd   :  { %225 = vsyncpa [#allocation6], 1 }
 0x1ce   :  { %226 = vsyncpa [#allocation9], 1 }
 0x1cf   :  { %227 = vsyncpa [#allocation4], 1 }

</bundles_post_ra>
